<compile_context>
chip_gen: v6e
topology: v6e:2x2x1
jax: 0.10.0
libtpu: 0.0.40
codegen_flags: <defaults>
</compile_context>

<pallas_src>
import jax
import jax.numpy as jnp
from jax.experimental import pallas as pl
from jax.experimental.pallas import tpu as pltpu


def _round_up(x, m):
    return (x + m - 1) // m * m


def _linear_kernel(z_ref, w_ref, b_ref, o_ref):
    # out = z @ W + b      (MXU matmul in f32 + VPU broadcast-add, fused)
    acc = jnp.dot(z_ref[...], w_ref[...], preferred_element_type=jnp.float32)
    o_ref[...] = (acc + b_ref[...]).astype(o_ref.dtype)


def decoder_forward(z, w_onelayer, b_onelayer, *, block_rows=512):
    """Pallas equivalent of Decoder.forward: z -> onelayer(z).

    z:           (B, latent_dim) float32
    w_onelayer:  (latent_dim, output_dim) float32  (transposed PyTorch weight)
    b_onelayer:  (output_dim,) float32
    """
    B, K = z.shape
    K2, N = w_onelayer.shape
    assert K == K2

    # ---- lane-dense output: pad N up to a multiple of 128, slice afterwards.
    N_pad = _round_up(N, 128)
    if N_pad != N:
        w = jnp.pad(w_onelayer, ((0, 0), (0, N_pad - N)))
        b = jnp.pad(b_onelayer, (0, N_pad - N))
    else:
        w, b = w_onelayer, b_onelayer
    b2d = b.reshape(1, N_pad)  # reshaped once here, resident across batch tiles

    # ---- batch tile: budget against v7x's scoped VMEM (the tightest target).
    # 2 double-buffered blocks (z tile + out tile) + resident weight/bias, f32.
    vmem_budget = 24 * 1024 * 1024
    resident_bytes = (K * N_pad + N_pad) * 4
    tm = max(8, min(block_rows, _round_up(B, 8)))
    while tm > 8 and 2 * 2 * (tm * K + tm * N_pad) * 4 + resident_bytes > vmem_budget:
        tm //= 2
    tm = max(8, (tm // 8) * 8)

    B_pad = _round_up(B, tm)
    zp = jnp.pad(z, ((0, B_pad - B), (0, 0))) if B_pad != B else z

    out_shape = jax.ShapeDtypeStruct((B_pad, N_pad), z.dtype)

    if B_pad == tm:
        # Single tile: skip the grid entirely (no per-step pipeline overhead).
        out = pl.pallas_call(
            _linear_kernel,
            out_shape=out_shape,
            in_specs=[
                pl.BlockSpec(memory_space=pltpu.MemorySpace.VMEM),
                pl.BlockSpec(memory_space=pltpu.MemorySpace.VMEM),
                pl.BlockSpec(memory_space=pltpu.MemorySpace.VMEM),
            ],
            out_specs=pl.BlockSpec(memory_space=pltpu.MemorySpace.VMEM),
            compiler_params=pltpu.CompilerParams(
                vmem_limit_bytes=32 * 1024 * 1024,
            ),
        )(zp, w, b2d)
    else:
        grid = (B_pad // tm,)
        out = pl.pallas_call(
            _linear_kernel,
            out_shape=out_shape,
            grid=grid,
            in_specs=[
                pl.BlockSpec((tm, K), lambda i: (i, 0)),      # z: batch-tiled
                pl.BlockSpec((K, N_pad), lambda i: (0, 0)),   # W: resident
                pl.BlockSpec((1, N_pad), lambda i: (0, 0)),   # b: resident
            ],
            out_specs=pl.BlockSpec((tm, N_pad), lambda i: (i, 0)),
            compiler_params=pltpu.CompilerParams(
                dimension_semantics=("parallel",),            # v7x: 2 TCs share batch
                vmem_limit_bytes=32 * 1024 * 1024,
            ),
        )(zp, w, b2d)

    return out[:B, :N]


def init_decoder_params(key, latent_dim, output_dim):
    """Deterministic init mirroring the module's parameter shapes.

    Only `onelayer` matters for forward(); lin_1 / lin_2 are created for
    shape fidelity but unused.
    """
    keys = jax.random.split(key, 8)

    # PyTorch Linear default: U(-1/sqrt(fan_in), 1/sqrt(fan_in))
    def lin_init(kw, kb, fan_in, fan_out):
        bound = 1.0 / jnp.sqrt(fan_in)
        wgt = jax.random.uniform(kw, (fan_in, fan_out), jnp.float32, -bound, bound)
        bia = jax.random.uniform(kb, (fan_out,), jnp.float32, -bound, bound)
        return wgt, bia

    params = {}
    # lin_1: Linear(latent_dim, 101) + BatchNorm1d(101) + ReLU6  (unused in forward)
    params["lin_1_w"], params["lin_1_b"] = lin_init(keys[0], keys[1], latent_dim, 101)
    params["bn_gamma"] = jnp.ones((101,), jnp.float32)
    params["bn_beta"] = jnp.zeros((101,), jnp.float32)
    # lin_2: Linear(101, 1)  (unused in forward)
    params["lin_2_w"], params["lin_2_b"] = lin_init(keys[2], keys[3], 101, 1)
    # onelayer: Linear(latent_dim, output_dim)  (the actual forward path)
    params["onelayer_w"], params["onelayer_b"] = lin_init(
        keys[4], keys[5], latent_dim, output_dim
    )
    return params


if __name__ == "__main__":
    latent_dim = 32
    output_dim = 16
    batch = 8

    key = jax.random.PRNGKey(0)
    k_z, k_p, k_z2 = jax.random.split(key, 3)

    z = jax.random.normal(k_z, (batch, latent_dim), dtype=jnp.float32)
    params = init_decoder_params(k_p, latent_dim, output_dim)

    # Small shape -> grid-less single-tile path.
    out = decoder_forward(z, params["onelayer_w"], params["onelayer_b"])
    out = jax.block_until_ready(out)
    ref = z @ params["onelayer_w"] + params["onelayer_b"]
    assert out.shape == (batch, output_dim)
    assert jnp.allclose(out, ref, atol=1e-5, rtol=1e-5)

    # Larger batch with a small forced tile -> exercises the batch-tiled,
    # "parallel"-gridded path (same semantics).
    z_big = jax.random.normal(k_z2, (48, latent_dim), dtype=jnp.float32)
    out_big = decoder_forward(
        z_big, params["onelayer_w"], params["onelayer_b"], block_rows=16
    )
    out_big = jax.block_until_ready(out_big)
    ref_big = z_big @ params["onelayer_w"] + params["onelayer_b"]
    assert out_big.shape == (48, output_dim)
    assert jnp.allclose(out_big, ref_big, atol=1e-5, rtol=1e-5)

    print("KERNEL_OK")
</pallas_src>

<mosaic_0001>
module attributes {stable_mosaic.version = 11 : i64} {
  func.func @_linear_kernel(%arg0: memref<8x32xf32, #tpu.memory_space<vmem>>, %arg1: memref<32x128xf32, #tpu.memory_space<vmem>>, %arg2: memref<1x128xf32, #tpu.memory_space<vmem>>, %arg3: memref<8x128xf32, #tpu.memory_space<vmem>>) attributes {dimension_semantics = [], scalar_prefetch = 0 : i64, scratch_operands = 0 : i64, tpu.core_type = #tpu.core_type<tc>} {
    %c0 = arith.constant 0 : index
    %c0_0 = arith.constant 0 : index
    %0 = vector.load %arg0[%c0, %c0_0] : memref<8x32xf32, #tpu.memory_space<vmem>>, vector<8x32xf32>
    %c0_1 = arith.constant 0 : index
    %c0_2 = arith.constant 0 : index
    %1 = vector.load %arg1[%c0_1, %c0_2] : memref<32x128xf32, #tpu.memory_space<vmem>>, vector<32x128xf32>
    %cst = arith.constant dense<0.000000e+00> : vector<8x128xf32>
    %2 = tpu.matmul %0, %1, %cst {dimension_numbers = #tpu.dot_dimension_numbers<[1], [0], [0], [1], [0, 0, 1, 1], [], []>} : vector<8x32xf32>, vector<32x128xf32>, vector<8x128xf32> -> vector<8x128xf32>
    %c0_3 = arith.constant 0 : index
    %c0_4 = arith.constant 0 : index
    %3 = vector.load %arg2[%c0_3, %c0_4] : memref<1x128xf32, #tpu.memory_space<vmem>>, vector<1x128xf32>
    %4 = vector.broadcast %3 : vector<1x128xf32> to vector<8x128xf32>
    %5 = arith.addf %2, %4 : vector<8x128xf32>
    %c0_5 = arith.constant 0 : index
    %c0_6 = arith.constant 0 : index
    %6 = vector.load %arg3[%c0_5, %c0_6] : memref<8x128xf32, #tpu.memory_space<vmem>>, vector<8x128xf32>
    tpu.vector_store %arg3[%c0_5, %c0_6], %5 {strides = array<i32>} : memref<8x128xf32, #tpu.memory_space<vmem>>, vector<8x128xf32>,
    return
  }
}

</mosaic_0001>

<bundles_post_ra>
// kernel: tpu_custom_call.1
= control target key start
LH: loop header
LB: loop body
LE: loop exit
PB: predicated region body
PF: predicated region fallthrough
CT: control target
= control target key end

     0   :  { %8 = vsyncpa [#allocation3], 0  ;;  %s274_s0 = inlined_call_operand.hbm [shape: f32[8,32], index: 0, kind: input, shape index: {}]   ;;  %s275_s1 = inlined_call_operand.hbm [shape: f32[32,128], index: 1, kind: input, shape index: {}]   ;;  %s276_s2 = inlined_call_operand.vmem [shape: f32[1,128], index: 2, kind: input, shape index: {}]   ;;  %s277_s3 = inlined_call_operand.hbm [shape: f32[8,128], index: 3, kind: output, shape index: {}]  }
   0x1   :  { %9 = vsyncpa [#allocation6], 0 }
   0x2   :  { %10 = vsyncpa [#allocation4], 0  ;;  %s235_s12 = smov [#allocation2]   ;;  %s236_s14 = smov [#allocation5]  }
   0x3   :  { %s17_s13 = sshll.u32 %s235_s12, 4  ;;  %s26_s15 = sshll.u32 %s236_s14, 4  ;;  %s18_s13 = int_to_ptr.vmem [resolvable:$true] %s17_s13  ;;  %s27_s15 = int_to_ptr.vmem [resolvable:$true] %s26_s15 }
   0x4   :  { %s177_s16 = scalar_lea.vmem %s18_s13, 128  ;;  %p182_p1 = scmp.lt.s32.totalorder %s18_s13, %s18_s13 }
   0x5   :  { %p178_p0 = scmp.ne.s32.totalorder %s18_s13, %s177_s16  ;;  %p183_p2 = scmp.lt.s32.totalorder %s177_s16, %s177_s16 }
   0x7   :  { %p184_p3 = por %p183_p2, %p182_p1 }
   0x9   :  { %p185_p4 = pnand %p184_p3, %p178_p0 }
   0xb   :  { %188 = shalt.err (!%p185_p4)
}
   0xc   :  { %20 = dma.hbm_to_vmem [thread:$0]  %s274_s0, 128, %s18_s13, [#allocation3]  }
   0xd   :  { %s197_s19 = scalar_lea.vmem %s27_s15, 512  ;;  %p202_p6 = scmp.lt.s32.totalorder %s27_s15, %s27_s15 }
   0xe   :  { %p198_p5 = scmp.ne.s32.totalorder %s27_s15, %s197_s19  ;;  %p203_p7 = scmp.lt.s32.totalorder %s197_s19, %s197_s19 }
  0x10   :  { %p204_p8 = por %p203_p7, %p202_p6 }
  0x12   :  { %p205_p9 = pnand %p204_p8, %p198_p5 }
  0x14   :  { %208 = shalt.err (!%p205_p9)
}
  0x15   :  { %s237_s20 = smov 128   ;;  %s238_s21 = smov 8  }
  0x16   :  { %32 = dma.hbm_to_vmem [thread:$0]  %s275_s1, 512, %s27_s15, [#allocation6], %s237_s20, %s237_s20, %s238_s21  }
  0x17   :  { %229 = dma.done.wait [#allocation3], 128  }
  0x18   :  { %230 = vsyncadd [#allocation3], 4294967168 }
  0x19   :  { %231 = dma.done.wait [#allocation6], 512  }
  0x1a   :  { %232 = vsyncadd [#allocation6], 4294966784  ;;  %v239_v0 = vmov 0.0   ;;  %vm240_vm0 = vmmov 0   ;;  %v45_v1 = vld [vmem:[#allocation5 + $0x18] sm:$0xff]  ;;  %v44_v2 = vld [vmem:[#allocation5 + $0x10] sm:$0xff] }
  0x1b   :  { %151 = vmatprep.subr.mxu0 %v239_v0  ;;  %159 = vmatprep.mubr.msk.f32.mxu0 %vm240_vm0, %v239_v0  ;;  %v43_v3 = vld [vmem:[#allocation5 + $0x8] sm:$0xff]  ;;  %v42_v4 = vld [vmem:[#allocation5] sm:$0xff]  ;;  %v41_v5 = vld [vmem:[#allocation2] sm:$0xff]  ;;  %vm53_vm1 = vcmask 261120   ;;  %s241_s24 = smov [#allocation7]  }
  0x1c   :  { %152 = vmatpush3.msra.mxu0 %v45_v1  ;;  %v144_v6 = vld [vmem:[%s276_s2] ss:$0 sm:$0xff]  ;;  %s134_s25 = sshll.u32 %s241_s24, 4  ;;  %s135_s25 = int_to_ptr.vmem [resolvable:$true] %s134_s25 }
  0x1d   :  { %153 = vmatprep.subr.mxu0 %v239_v0  ;;  %s209_s26 = scalar_lea.vmem %s135_s25, 128  ;;  %p214_p11 = scmp.lt.s32.totalorder %s135_s25, %s135_s25 }
  0x1e   :  { %154 = vmatpush3.msra.mxu0 %v44_v2  ;;  %p210_p10 = scmp.ne.s32.totalorder %s135_s25, %s209_s26  ;;  %p215_p12 = scmp.lt.s32.totalorder %s209_s26, %s209_s26 }
  0x1f   :  { %155 = vmatprep.subr.mxu0 %v239_v0 }
  0x20   :  { %156 = vmatpush3.msra.mxu0 %v43_v3  ;;  %p216_p13 = por %p215_p12, %p214_p11 }
  0x21   :  { %157 = vmatprep.subr.mxu0 %v239_v0 }
  0x22   :  { %158 = vmatpush3.msra.mxu0 %v42_v4  ;;  %p217_p0 = pnand %p216_p13, %p210_p10 }
  0x23   :  { %160 = vmatmul.mubr.msk.f32.vlgmr.msra.gmra.mxu0 %vm53_vm1, %v41_v5 }
  0xe3   :  { %v123_v7 = vpop.f32.mrf.mxu0 }
  0xe4   :  { %v124_v8 = vadd.f32 %v144_v6, %v123_v7 }
  0xe5   :  { %v161_v9 = vpop.f32.mrf.mxu0 }
  0xe6   :  { %127 = vst [vmem:[#allocation7] sm:$0xff] %v124_v8 }
  0xe7   :  { %220 = shalt.err (!%p217_p0)
}
  0xe8   :  { %137 = dma.vmem_to_hbm [thread:$0]  %s135_s25, 128, %s277_s3, [#allocation4]  }
  0xe9   :  { %233 = dma.done.wait [#allocation4], 128  }
  0xea   :  { %234 = vsyncadd [#allocation4], 4294967168 }
  0xeb   :  { %141 = vsyncpa [#allocation3], 1 }
  0xec   :  { %142 = vsyncpa [#allocation6], 1 }
  0xed   :  { %143 = vsyncpa [#allocation4], 1 }

</bundles_post_ra>
